<compile_context>
chip_gen: v7x
topology: tpu7x:2x2x1
jax: 0.10.0
libtpu: 0.0.40
codegen_flags: <defaults>
</compile_context>

<pallas_src>
import functools

import numpy as np
import jax
import jax.numpy as jnp
from jax.experimental import pallas as pl
from jax.experimental.pallas import tpu as pltpu

_LANE = 128


def _hanning_1d(filter_size: int = 5) -> np.ndarray:
    """1-D separable factor: g / g.sum() == outer(a/sum(a), a/sum(a))."""
    a = np.hanning(filter_size)[1:-1]            # length filter_size - 2
    return (a / a.sum()).astype(np.float64)


def _make_filter(filter_size: int = 5) -> np.ndarray:
    """Deterministic 2-D Hanning filter, identical to the PyTorch buffer."""
    a = np.hanning(filter_size)[1:-1]
    g = a[:, None] * a[None, :]
    g = g / g.sum()
    return g.astype(np.float32)                  # (k, k), k = filter_size - 2


def _vmem_limits():
    """(per-block working-set budget, scoped vmem_limit_bytes cap) in bytes."""
    try:
        info = pltpu.get_tpu_info()
        phys = int(getattr(info, "vmem_capacity_bytes"))
    except Exception:
        phys = 64 * 1024 * 1024                  # v7x has the smallest VMEM
    budget = min(phys // 3, 40 * 1024 * 1024)
    cap = min(phys - 16 * 1024 * 1024, 96 * 1024 * 1024)
    return budget, max(cap, 16 * 1024 * 1024)


def _l2pool_kernel(x_ref, o_ref, xsq_ref, tmp_ref, *, taps, k, stride, pad,
                   h_in, w_in, h_out, w_out):
    # x_ref  : (h_in , w_in , TN)            unpadded input block (lanes = B*C)
    # o_ref  : (h_out, w_out, TN)
    # xsq_ref: (h_in + 2*pad, w_in, TN) f32  squared input, zero-padded in H
    # tmp_ref: (h_out, w_in + 2*pad, TN) f32 row-pass result, zero-padded in W
    tn = o_ref.shape[-1]

    # Zero the pad borders every grid step (cheap: 2*pad rows + 2*pad cols),
    # so it is correct under megacore grid sharding.  Zero borders of x**2
    # == zero-padding of the conv input.
    if pad > 0:
        zr = jnp.zeros((pad, w_in, tn), jnp.float32)
        xsq_ref[pl.ds(0, pad), :, :] = zr
        xsq_ref[pl.ds(h_in + pad, pad), :, :] = zr
        zc = jnp.zeros((h_out, pad, tn), jnp.float32)
        tmp_ref[:, pl.ds(0, pad), :] = zc
        tmp_ref[:, pl.ds(w_in + pad, pad), :] = zc

    # Square the input tile exactly once.
    x = x_ref[...].astype(jnp.float32)
    xsq_ref[pl.ds(pad, h_in), :, :] = x * x

    # Pass 1 (H direction, strided on the *leading* axis -> pure addressing):
    #   tmp[i, w] = sum_ky taps[ky] * xsq[stride*i + ky, w]
    acc = None
    for ky in range(k):
        tap = xsq_ref[pl.ds(ky, h_out, stride=stride), :, :]
        term = taps[ky] * tap
        acc = term if acc is None else acc + term
    tmp_ref[:, pl.ds(pad, w_in), :] = acc

    # Pass 2 (W direction, strided on the sublane axis; lanes stay dense):
    #   out[i, j] = sum_kx taps[kx] * tmp[i, stride*j + kx]
    acc2 = None
    for kx in range(k):
        tap = tmp_ref[:, pl.ds(kx, w_out, stride=stride), :]
        term = taps[kx] * tap
        acc2 = term if acc2 is None else acc2 + term

    o_ref[...] = jnp.sqrt(acc2 + 1e-12).astype(o_ref.dtype)


def l2pooling(x: jax.Array, filter_size: int = 5, stride: int = 2,
              pad_off: int = 0) -> jax.Array:
    """Equivalent of L2pooling.forward for NCHW input x."""
    del pad_off  # unused by the reference forward pass
    B, C, H, W = x.shape
    k = filter_size - 2
    pad = (filter_size - 2) // 2                 # = 1 for filter_size=5
    h_out = (H + 2 * pad - k) // stride + 1
    w_out = (W + 2 * pad - k) // stride + 1
    h_pad = H + 2 * pad
    w_pad = W + 2 * pad
    N = B * C
    itemsize = x.dtype.itemsize

    taps = tuple(float(v) for v in _hanning_1d(filter_size))

    # Channels-last: (H, W, B*C) with channels on the lane axis.
    xc = jnp.transpose(x, (2, 3, 0, 1)).reshape(H, W, N)

    budget, vmem_cap = _vmem_limits()
    per_lane = (2 * H * W * itemsize             # double-buffered input block
                + h_pad * W * 4                  # squared f32 scratch (H-pad)
                + h_out * w_pad * 4              # row-pass f32 scratch (W-pad)
                + 2 * h_out * w_out * itemsize)  # double-buffered output block
    if N < _LANE:
        tn = N
        n_total = N
    else:
        n_total = ((N + _LANE - 1) // _LANE) * _LANE
        tn = _LANE
        while (tn * 2 <= n_total and n_total % (tn * 2) == 0
               and per_lane * tn * 2 <= budget):
            tn *= 2
    if n_total != N:
        xc = jnp.pad(xc, ((0, 0), (0, 0), (0, n_total - N)))
    # TODO(synk): add halo-tiled spatial blocking for very large H*W where a
    # full-image lane block would not fit in VMEM.

    grid = (n_total // tn,)
    block_bytes = per_lane * tn
    vmem_limit = int(min(max(2 * block_bytes, 16 * 1024 * 1024), vmem_cap))

    kern = functools.partial(
        _l2pool_kernel, taps=taps, k=k, stride=stride, pad=pad,
        h_in=H, w_in=W, h_out=h_out, w_out=w_out)

    n_out = h_out * w_out * n_total
    cost = pl.CostEstimate(
        flops=int(H * W * n_total                        # squaring
                  + (2 * k - 1) * h_out * W * n_total    # row pass
                  + (2 * k - 1) * n_out),                # col pass
        transcendentals=int(n_out),
        bytes_accessed=int((H * W + h_out * w_out) * n_total * itemsize))

    out = pl.pallas_call(
        kern,
        out_shape=jax.ShapeDtypeStruct((h_out, w_out, n_total), x.dtype),
        grid=grid,
        in_specs=[pl.BlockSpec((H, W, tn), lambda i: (0, 0, i))],
        out_specs=pl.BlockSpec((h_out, w_out, tn), lambda i: (0, 0, i)),
        scratch_shapes=[pltpu.VMEM((h_pad, W, tn), jnp.float32),
                        pltpu.VMEM((h_out, w_pad, tn), jnp.float32)],
        compiler_params=pltpu.CompilerParams(
            dimension_semantics=("parallel",),
            vmem_limit_bytes=vmem_limit),
        cost_estimate=cost,
    )(xc)

    out = out[:, :, :N]
    return jnp.transpose(out.reshape(h_out, w_out, B, C), (2, 3, 0, 1))


def _reference(x: jax.Array, filter_size: int = 5, stride: int = 2) -> jax.Array:
    """Pure-JAX reference using a real grouped conv (mirrors F.conv2d)."""
    B, C, H, W = x.shape
    k = filter_size - 2
    padding = (filter_size - 2) // 2
    g = jnp.asarray(_make_filter(filter_size))
    filt = jnp.broadcast_to(g[None, None, :, :], (C, 1, k, k))  # OIHW, groups=C
    out = jax.lax.conv_general_dilated(
        (x.astype(jnp.float32)) ** 2,
        filt,
        window_strides=(stride, stride),
        padding=[(padding, padding), (padding, padding)],
        dimension_numbers=("NCHW", "OIHW", "NCHW"),
        feature_group_count=C,
    )
    return jnp.sqrt(out + 1e-12).astype(x.dtype)


if __name__ == "__main__":
    key = jax.random.PRNGKey(0)

    # Small spec-sized case: B=2, C=4, H=W=16  (N = 8 -> single block).
    B, C, H, W = 2, 4, 16, 16
    x = jax.random.normal(key, (B, C, H, W), dtype=jnp.float32)
    y = jax.block_until_ready(l2pooling(x, filter_size=5, stride=2))
    y_ref = _reference(x, filter_size=5, stride=2)
    assert y.shape == (B, C, 8, 8), y.shape
    np.testing.assert_allclose(np.asarray(y), np.asarray(y_ref),
                               rtol=1e-5, atol=1e-6)

    # Larger case exercising the lane-dense, multi-step grid path
    # (N = 384 -> grid of 3 lane-blocks of 128) and odd spatial extents.
    x2 = jax.random.normal(jax.random.PRNGKey(1), (3, 128, 17, 17),
                           dtype=jnp.float32)
    y2 = jax.block_until_ready(l2pooling(x2, filter_size=5, stride=2))
    y2_ref = _reference(x2, filter_size=5, stride=2)
    assert y2.shape == (3, 128, 9, 9), y2.shape
    np.testing.assert_allclose(np.asarray(y2), np.asarray(y2_ref),
                               rtol=1e-5, atol=1e-6)

    # Non-multiple-of-128 lane count (N = 192 -> padded lane axis).
    x3 = jax.random.normal(jax.random.PRNGKey(2), (3, 64, 16, 16),
                           dtype=jnp.float32)
    y3 = jax.block_until_ready(l2pooling(x3, filter_size=5, stride=2))
    y3_ref = _reference(x3, filter_size=5, stride=2)
    assert y3.shape == (3, 64, 8, 8), y3.shape
    np.testing.assert_allclose(np.asarray(y3), np.asarray(y3_ref),
                               rtol=1e-5, atol=1e-6)

    print("KERNEL_OK")
</pallas_src>

<mosaic_0001>
module attributes {stable_mosaic.version = 11 : i64} {
  func.func @_l2pool_kernel(%arg0: i32, %arg1: memref<16x16x8xf32, #tpu.memory_space<vmem>>, %arg2: memref<8x8x8xf32, #tpu.memory_space<vmem>>, %arg3: memref<18x16x8xf32, #tpu.memory_space<vmem>>, %arg4: memref<8x18x8xf32, #tpu.memory_space<vmem>>) attributes {dimension_semantics = [#tpu.dimension_semantics<parallel>], iteration_bounds = array<i64: 1>, scalar_prefetch = 0 : i64, scratch_operands = 2 : i64, tpu.core_type = #tpu.core_type<tc>, window_params = [{transform_indices = @transform_0, window_bounds = array<i64: 16, 16, 8>}, {transform_indices = @transform_1, window_bounds = array<i64: 8, 8, 8>}]} {
    %cst = arith.constant 0.000000e+00 : f32
    %0 = vector.broadcast %cst : f32 to vector<1x16x8xf32>
    %c0 = arith.constant 0 : index
    %c0_0 = arith.constant 0 : index
    %c0_1 = arith.constant 0 : index
    %1 = vector.load %arg3[%c0, %c0_0, %c0_1] : memref<18x16x8xf32, #tpu.memory_space<vmem>>, vector<1x16x8xf32>
    tpu.vector_store %arg3[%c0, %c0_0, %c0_1], %0 {strides = array<i32>} : memref<18x16x8xf32, #tpu.memory_space<vmem>>, vector<1x16x8xf32>,
    %c17 = arith.constant 17 : index
    %c0_2 = arith.constant 0 : index
    %c0_3 = arith.constant 0 : index
    %2 = vector.load %arg3[%c17, %c0_2, %c0_3] : memref<18x16x8xf32, #tpu.memory_space<vmem>>, vector<1x16x8xf32>
    tpu.vector_store %arg3[%c17, %c0_2, %c0_3], %0 {strides = array<i32>} : memref<18x16x8xf32, #tpu.memory_space<vmem>>, vector<1x16x8xf32>,
    %cst_4 = arith.constant 0.000000e+00 : f32
    %3 = vector.broadcast %cst_4 : f32 to vector<8x1x8xf32>
    %c0_5 = arith.constant 0 : index
    %c0_6 = arith.constant 0 : index
    %c0_7 = arith.constant 0 : index
    %4 = vector.load %arg4[%c0_5, %c0_6, %c0_7] : memref<8x18x8xf32, #tpu.memory_space<vmem>>, vector<8x1x8xf32>
    tpu.vector_store %arg4[%c0_5, %c0_6, %c0_7], %3 {strides = array<i32>} : memref<8x18x8xf32, #tpu.memory_space<vmem>>, vector<8x1x8xf32>,
    %c0_8 = arith.constant 0 : index
    %c17_9 = arith.constant 17 : index
    %c0_10 = arith.constant 0 : index
    %5 = vector.load %arg4[%c0_8, %c17_9, %c0_10] : memref<8x18x8xf32, #tpu.memory_space<vmem>>, vector<8x1x8xf32>
    tpu.vector_store %arg4[%c0_8, %c17_9, %c0_10], %3 {strides = array<i32>} : memref<8x18x8xf32, #tpu.memory_space<vmem>>, vector<8x1x8xf32>,
    %c0_11 = arith.constant 0 : index
    %c0_12 = arith.constant 0 : index
    %c0_13 = arith.constant 0 : index
    %6 = vector.load %arg1[%c0_11, %c0_12, %c0_13] : memref<16x16x8xf32, #tpu.memory_space<vmem>>, vector<16x16x8xf32>
    %7 = arith.mulf %6, %6 : vector<16x16x8xf32>
    %c1 = arith.constant 1 : index
    %c0_14 = arith.constant 0 : index
    %c0_15 = arith.constant 0 : index
    %8 = vector.load %arg3[%c1, %c0_14, %c0_15] : memref<18x16x8xf32, #tpu.memory_space<vmem>>, vector<16x16x8xf32>
    tpu.vector_store %arg3[%c1, %c0_14, %c0_15], %7 {strides = array<i32>} : memref<18x16x8xf32, #tpu.memory_space<vmem>>, vector<16x16x8xf32>,
    %c0_16 = arith.constant 0 : index
    %c0_17 = arith.constant 0 : index
    %c0_18 = arith.constant 0 : index
    %9 = tpu.strided_load %arg3[%c0_16, %c0_17, %c0_18] {strides = array<i32: 2, 1, 1>} : memref<18x16x8xf32, #tpu.memory_space<vmem>>, vector<8x16x8xf32>
    %cst_19 = arith.constant 2.500000e-01 : f32
    %10 = vector.broadcast %cst_19 : f32 to vector<8x16x8xf32>
    %11 = arith.mulf %10, %9 : vector<8x16x8xf32>
    %c1_20 = arith.constant 1 : index
    %c0_21 = arith.constant 0 : index
    %c0_22 = arith.constant 0 : index
    %12 = tpu.strided_load %arg3[%c1_20, %c0_21, %c0_22] {strides = array<i32: 2, 1, 1>} : memref<18x16x8xf32, #tpu.memory_space<vmem>>, vector<8x16x8xf32>
    %cst_23 = arith.constant 5.000000e-01 : f32
    %13 = vector.broadcast %cst_23 : f32 to vector<8x16x8xf32>
    %14 = arith.mulf %13, %12 : vector<8x16x8xf32>
    %15 = arith.addf %11, %14 : vector<8x16x8xf32>
    %c2 = arith.constant 2 : index
    %c0_24 = arith.constant 0 : index
    %c0_25 = arith.constant 0 : index
    %16 = tpu.strided_load %arg3[%c2, %c0_24, %c0_25] {strides = array<i32: 2, 1, 1>} : memref<18x16x8xf32, #tpu.memory_space<vmem>>, vector<8x16x8xf32>
    %cst_26 = arith.constant 2.500000e-01 : f32
    %17 = vector.broadcast %cst_26 : f32 to vector<8x16x8xf32>
    %18 = arith.mulf %17, %16 : vector<8x16x8xf32>
    %19 = arith.addf %15, %18 : vector<8x16x8xf32>
    %c0_27 = arith.constant 0 : index
    %c1_28 = arith.constant 1 : index
    %c0_29 = arith.constant 0 : index
    %20 = vector.load %arg4[%c0_27, %c1_28, %c0_29] : memref<8x18x8xf32, #tpu.memory_space<vmem>>, vector<8x16x8xf32>
    tpu.vector_store %arg4[%c0_27, %c1_28, %c0_29], %19 {strides = array<i32>} : memref<8x18x8xf32, #tpu.memory_space<vmem>>, vector<8x16x8xf32>,
    %c0_30 = arith.constant 0 : index
    %c0_31 = arith.constant 0 : index
    %c0_32 = arith.constant 0 : index
    %21 = tpu.strided_load %arg4[%c0_30, %c0_31, %c0_32] {strides = array<i32: 1, 2, 1>} : memref<8x18x8xf32, #tpu.memory_space<vmem>>, vector<8x8x8xf32>
    %cst_33 = arith.constant 2.500000e-01 : f32
    %22 = vector.broadcast %cst_33 : f32 to vector<8x8x8xf32>
    %23 = arith.mulf %22, %21 : vector<8x8x8xf32>
    %c0_34 = arith.constant 0 : index
    %c1_35 = arith.constant 1 : index
    %c0_36 = arith.constant 0 : index
    %24 = tpu.strided_load %arg4[%c0_34, %c1_35, %c0_36] {strides = array<i32: 1, 2, 1>} : memref<8x18x8xf32, #tpu.memory_space<vmem>>, vector<8x8x8xf32>
    %cst_37 = arith.constant 5.000000e-01 : f32
    %25 = vector.broadcast %cst_37 : f32 to vector<8x8x8xf32>
    %26 = arith.mulf %25, %24 : vector<8x8x8xf32>
    %27 = arith.addf %23, %26 : vector<8x8x8xf32>
    %c0_38 = arith.constant 0 : index
    %c2_39 = arith.constant 2 : index
    %c0_40 = arith.constant 0 : index
    %28 = tpu.strided_load %arg4[%c0_38, %c2_39, %c0_40] {strides = array<i32: 1, 2, 1>} : memref<8x18x8xf32, #tpu.memory_space<vmem>>, vector<8x8x8xf32>
    %cst_41 = arith.constant 2.500000e-01 : f32
    %29 = vector.broadcast %cst_41 : f32 to vector<8x8x8xf32>
    %30 = arith.mulf %29, %28 : vector<8x8x8xf32>
    %31 = arith.addf %27, %30 : vector<8x8x8xf32>
    %cst_42 = arith.constant 9.99999996E-13 : f32
    %32 = vector.broadcast %cst_42 : f32 to vector<8x8x8xf32>
    %33 = arith.addf %31, %32 : vector<8x8x8xf32>
    %34 = math.sqrt %33 : vector<8x8x8xf32>
    %c0_43 = arith.constant 0 : index
    %c0_44 = arith.constant 0 : index
    %c0_45 = arith.constant 0 : index
    %35 = vector.load %arg2[%c0_43, %c0_44, %c0_45] : memref<8x8x8xf32, #tpu.memory_space<vmem>>, vector<8x8x8xf32>
    tpu.vector_store %arg2[%c0_43, %c0_44, %c0_45], %34 {strides = array<i32>} : memref<8x8x8xf32, #tpu.memory_space<vmem>>, vector<8x8x8xf32>,
    return
  }
  func.func @transform_0(%arg0: i32) -> (i32, i32, i32) {
    %c0_i32 = arith.constant 0 : i32
    %c0_i32_0 = arith.constant 0 : i32
    %c0_i32_1 = arith.constant 0 : i32
    return %c0_i32, %c0_i32_0, %arg0 : i32, i32, i32
  }
  func.func @transform_1(%arg0: i32) -> (i32, i32, i32) {
    %c0_i32 = arith.constant 0 : i32
    %c0_i32_0 = arith.constant 0 : i32
    %c0_i32_1 = arith.constant 0 : i32
    return %c0_i32, %c0_i32_0, %arg0 : i32, i32, i32
  }
}

</mosaic_0001>

<bundles_post_ra>
// kernel: tpu_custom_call.1
= control target key start
LH: loop header
LB: loop body
LE: loop exit
PB: predicated region body
PF: predicated region fallthrough
CT: control target
= control target key end

     0   :  { %vm9_vm0 = vcmask 64512   ;;  %vm15_vm1 = vcmask 57344   ;;  %v493_v3 = vmov 0.0   ;;  %s681_s0 = inlined_call_operand.vmem [shape: f32[16,16,8], index: 0, kind: input, shape index: {}]   ;;  %s682_s1 = inlined_call_operand.hbm [shape: f32[8,8,8], index: 1, kind: output, shape index: {}]  }
   0x1   :  { %v32_v0 = vld [vmem:[%s681_s0] sm:$0xff]  ;;  %v33_v1 = vld [vmem:[%s681_s0 + $0x8] sm:$0xff]  ;;  %v34_v2 = vld [vmem:[%s681_s0 + $0x10] sm:$0xff]  ;;  %10 = vst.msk [vmem:[#allocation2] sm:$0xff] %vm9_vm0, %v493_v3 }
   0x2   :  { %11 = vst.msk [vmem:[#allocation2 + $0x8] sm:$0xff] %vm9_vm0, %v493_v3  ;;  %v64_v4 = vmul.f32 %v32_v0, %v32_v0  ;;  %v65_v5 = vmul.f32 %v33_v1, %v33_v1  ;;  %v66_v6 = vmul.f32 %v34_v2, %v34_v2  ;;  %v35_v7 = vld [vmem:[%s681_s0 + $0x18] sm:$0xff]  ;;  %v36_v8 = vld [vmem:[%s681_s0 + $0x20] sm:$0xff]  ;;  %v37_v9 = vld [vmem:[%s681_s0 + $0x28] sm:$0xff] }
   0x3   :  { %16 = vst.msk [vmem:[#allocation3] sm:$0x1] %vm15_vm1, %v493_v3  ;;  %17 = vst.msk [vmem:[#allocation3 + $0x18] sm:$0x1] %vm15_vm1, %v493_v3  ;;  %v67_v10 = vmul.f32 %v35_v7, %v35_v7  ;;  %v68_v11 = vmul.f32 %v36_v8, %v36_v8  ;;  %v69_v12 = vmul.f32 %v37_v9, %v37_v9  ;;  %v38_v13 = vld [vmem:[%s681_s0 + $0x30] sm:$0xff]  ;;  %v39_v14 = vld [vmem:[%s681_s0 + $0x38] sm:$0xff] }
   0x4   :  { %18 = vst.msk [vmem:[#allocation3 + $0x30] sm:$0x1] %vm15_vm1, %v493_v3  ;;  %19 = vst.msk [vmem:[#allocation3 + $0x48] sm:$0x1] %vm15_vm1, %v493_v3  ;;  %v40_v15 = vld [vmem:[%s681_s0 + $0x40] sm:$0xff]  ;;  %v70_v16 = vmul.f32 %v38_v13, %v38_v13  ;;  %v71_v17 = vmul.f32 %v39_v14, %v39_v14  ;;  %v41_v19 = vld [vmem:[%s681_s0 + $0x48] sm:$0xff] }
   0x5   :  { %20 = vst.msk [vmem:[#allocation3 + $0x60] sm:$0x1] %vm15_vm1, %v493_v3  ;;  %21 = vst.msk [vmem:[#allocation3 + $0x78] sm:$0x1] %vm15_vm1, %v493_v3  ;;  %v72_v18 = vmul.f32 %v40_v15, %v40_v15  ;;  %v42_v20 = vld [vmem:[%s681_s0 + $0x50] sm:$0xff]  ;;  %v43_v21 = vld [vmem:[%s681_s0 + $0x58] sm:$0xff]  ;;  %v73_v22 = vmul.f32 %v41_v19, %v41_v19 }
   0x6   :  { %22 = vst.msk [vmem:[#allocation3 + $0x90] sm:$0x1] %vm15_vm1, %v493_v3  ;;  %23 = vst.msk [vmem:[#allocation3 + $0xa8] sm:$0x1] %vm15_vm1, %v493_v3  ;;  %v74_v23 = vmul.f32 %v42_v20, %v42_v20  ;;  %v75_v24 = vmul.f32 %v43_v21, %v43_v21  ;;  %v44_v25 = vld [vmem:[%s681_s0 + $0x60] sm:$0xff]  ;;  %v45_v26 = vld [vmem:[%s681_s0 + $0x68] sm:$0xff] }
   0x7   :  { %97 = vst.msk [vmem:[#allocation2 + $0x10] sm:$0xff] %vm9_vm0, %v64_v4  ;;  %98 = vst.msk [vmem:[#allocation2 + $0x18] sm:$0xff] %vm9_vm0, %v65_v5  ;;  %v46_v27 = vld [vmem:[%s681_s0 + $0x70] sm:$0xff]  ;;  %v76_v28 = vmul.f32 %v44_v25, %v44_v25  ;;  %v77_v29 = vmul.f32 %v45_v26, %v45_v26  ;;  %v47_v31 = vld [vmem:[%s681_s0 + $0x78] sm:$0xff] }
   0x8   :  { %99 = vst.msk [vmem:[#allocation2 + $0x20] sm:$0xff] %vm9_vm0, %v66_v6  ;;  %100 = vst.msk [vmem:[#allocation2 + $0x28] sm:$0xff] %vm9_vm0, %v67_v10  ;;  %v78_v30 = vmul.f32 %v46_v27, %v46_v27  ;;  %v48_v32 = vld [vmem:[%s681_s0 + $0x80] sm:$0xff]  ;;  %v49_v33 = vld [vmem:[%s681_s0 + $0x88] sm:$0xff]  ;;  %v79_v34 = vmul.f32 %v47_v31, %v47_v31 }
   0x9   :  { %101 = vst.msk [vmem:[#allocation2 + $0x30] sm:$0xff] %vm9_vm0, %v68_v11  ;;  %102 = vst.msk [vmem:[#allocation2 + $0x38] sm:$0xff] %vm9_vm0, %v69_v12  ;;  %v80_v35 = vmul.f32 %v48_v32, %v48_v32  ;;  %v81_v36 = vmul.f32 %v49_v33, %v49_v33  ;;  %v50_v37 = vld [vmem:[%s681_s0 + $0x90] sm:$0xff]  ;;  %v51_v38 = vld [vmem:[%s681_s0 + $0x98] sm:$0xff] }
   0xa   :  { %103 = vst.msk [vmem:[#allocation2 + $0x40] sm:$0xff] %vm9_vm0, %v70_v16  ;;  %104 = vst.msk [vmem:[#allocation2 + $0x48] sm:$0xff] %vm9_vm0, %v71_v17  ;;  %v52_v39 = vld [vmem:[%s681_s0 + $0xa0] sm:$0xff]  ;;  %v82_v40 = vmul.f32 %v50_v37, %v50_v37  ;;  %v83_v41 = vmul.f32 %v51_v38, %v51_v38  ;;  %v53_v43 = vld [vmem:[%s681_s0 + $0xa8] sm:$0xff] }
   0xb   :  { %105 = vst.msk [vmem:[#allocation2 + $0x50] sm:$0xff] %vm9_vm0, %v72_v18  ;;  %106 = vst.msk [vmem:[#allocation2 + $0x58] sm:$0xff] %vm9_vm0, %v73_v22  ;;  %v84_v42 = vmul.f32 %v52_v39, %v52_v39  ;;  %v54_v44 = vld [vmem:[%s681_s0 + $0xb0] sm:$0xff]  ;;  %v55_v45 = vld [vmem:[%s681_s0 + $0xb8] sm:$0xff]  ;;  %v85_v46 = vmul.f32 %v53_v43, %v53_v43 }
   0xc   :  { %107 = vst.msk [vmem:[#allocation2 + $0x60] sm:$0xff] %vm9_vm0, %v74_v23  ;;  %108 = vst.msk [vmem:[#allocation2 + $0x68] sm:$0xff] %vm9_vm0, %v75_v24  ;;  %v86_v47 = vmul.f32 %v54_v44, %v54_v44  ;;  %v87_v48 = vmul.f32 %v55_v45, %v55_v45  ;;  %v56_v49 = vld [vmem:[%s681_s0 + $0xc0] sm:$0xff]  ;;  %v57_v50 = vld [vmem:[%s681_s0 + $0xc8] sm:$0xff] }
   0xd   :  { %109 = vst.msk [vmem:[#allocation2 + $0x70] sm:$0xff] %vm9_vm0, %v76_v28  ;;  %110 = vst.msk [vmem:[#allocation2 + $0x78] sm:$0xff] %vm9_vm0, %v77_v29  ;;  %v58_v51 = vld [vmem:[%s681_s0 + $0xd0] sm:$0xff]  ;;  %v88_v52 = vmul.f32 %v56_v49, %v56_v49  ;;  %v89_v53 = vmul.f32 %v57_v50, %v57_v50  ;;  %v59_v55 = vld [vmem:[%s681_s0 + $0xd8] sm:$0xff] }
   0xe   :  { %111 = vst.msk [vmem:[#allocation2 + $0x80] sm:$0xff] %vm9_vm0, %v78_v30  ;;  %112 = vst.msk [vmem:[#allocation2 + $0x88] sm:$0xff] %vm9_vm0, %v79_v34  ;;  %v90_v54 = vmul.f32 %v58_v51, %v58_v51  ;;  %v60_v56 = vld [vmem:[%s681_s0 + $0xe0] sm:$0xff]  ;;  %v61_v57 = vld [vmem:[%s681_s0 + $0xe8] sm:$0xff]  ;;  %v91_v58 = vmul.f32 %v59_v55, %v59_v55 }
   0xf   :  { %113 = vst.msk [vmem:[#allocation2 + $0x90] sm:$0xff] %vm9_vm0, %v80_v35  ;;  %114 = vst.msk [vmem:[#allocation2 + $0x98] sm:$0xff] %vm9_vm0, %v81_v36  ;;  %v92_v59 = vmul.f32 %v60_v56, %v60_v56  ;;  %v93_v60 = vmul.f32 %v61_v57, %v61_v57  ;;  %v62_v61 = vld [vmem:[%s681_s0 + $0xf0] sm:$0xff]  ;;  %v63_v62 = vld [vmem:[%s681_s0 + $0xf8] sm:$0xff] }
  0x10   :  { %115 = vst.msk [vmem:[#allocation2 + $0xa0] sm:$0xff] %vm9_vm0, %v82_v40  ;;  %116 = vst.msk [vmem:[#allocation2 + $0xa8] sm:$0xff] %vm9_vm0, %v83_v41  ;;  %v129_v63 = vld [vmem:[#allocation2] sm:$0xff]  ;;  %v94_v0 = vmul.f32 %v62_v61, %v62_v61  ;;  %v95_v1 = vmul.f32 %v63_v62, %v63_v62  ;;  %v161_v3 = vld [vmem:[#allocation2 + $0x10] sm:$0xff] }
  0x11   :  { %117 = vst.msk [vmem:[#allocation2 + $0xb0] sm:$0xff] %vm9_vm0, %v84_v42  ;;  %118 = vst.msk [vmem:[#allocation2 + $0xb8] sm:$0xff] %vm9_vm0, %v85_v46  ;;  %v145_v2 = vmul.f32 0.25, %v129_v63  ;;  %v210_v4 = vld [vmem:[#allocation2 + $0x20] sm:$0xff]  ;;  %v130_v5 = vld [vmem:[#allocation2 + $0x8] sm:$0xff]  ;;  %v177_v6 = vmul.f32 0.5, %v161_v3 }
  0x12   :  { %119 = vst.msk [vmem:[#allocation2 + $0xc0] sm:$0xff] %vm9_vm0, %v86_v47  ;;  %120 = vst.msk [vmem:[#allocation2 + $0xc8] sm:$0xff] %vm9_vm0, %v87_v48  ;;  %v226_v7 = vmul.f32 0.25, %v210_v4  ;;  %v146_v8 = vmul.f32 0.25, %v130_v5  ;;  %v162_v9 = vld [vmem:[#allocation2 + $0x18] sm:$0xff]  ;;  %v211_v10 = vld [vmem:[#allocation2 + $0x28] sm:$0xff] }
  0x13   :  { %121 = vst.msk [vmem:[#allocation2 + $0xd0] sm:$0xff] %vm9_vm0, %v88_v52  ;;  %122 = vst.msk [vmem:[#allocation2 + $0xd8] sm:$0xff] %vm9_vm0, %v89_v53  ;;  %v163_v11 = vld [vmem:[#allocation2 + $0x30] sm:$0xff]  ;;  %v178_v12 = vmul.f32 0.5, %v162_v9  ;;  %v227_v13 = vmul.f32 0.25, %v211_v10  ;;  %v212_v15 = vld [vmem:[#allocation2 + $0x40] sm:$0xff]  ;;  %v193_v18 = vadd.f32 %v177_v6, %v145_v2 }
  0x14   :  { %123 = vst.msk [vmem:[#allocation2 + $0xe0] sm:$0xff] %vm9_vm0, %v90_v54  ;;  %124 = vst.msk [vmem:[#allocation2 + $0xe8] sm:$0xff] %vm9_vm0, %v91_v58  ;;  %v179_v14 = vmul.f32 0.5, %v163_v11  ;;  %v164_v16 = vld [vmem:[#allocation2 + $0x38] sm:$0xff]  ;;  %v213_v17 = vld [vmem:[#allocation2 + $0x48] sm:$0xff]  ;;  %v228_v19 = vmul.f32 0.25, %v212_v15 }
  0x15   :  { %125 = vst.msk [vmem:[#allocation2 + $0xf0] sm:$0xff] %vm9_vm0, %v92_v59  ;;  %126 = vst.msk [vmem:[#allocation2 + $0xf8] sm:$0xff] %vm9_vm0, %v93_v60  ;;  %v180_v20 = vmul.f32 0.5, %v164_v16  ;;  %v229_v21 = vmul.f32 0.25, %v213_v17  ;;  %v165_v22 = vld [vmem:[#allocation2 + $0x50] sm:$0xff]  ;;  %v214_v23 = vld [vmem:[#allocation2 + $0x60] sm:$0xff]  ;;  %v194_v25 = vadd.f32 %v178_v12, %v146_v8  ;;  %v242_v32 = vadd.f32 %v226_v7, %v193_v18 }
  0x16   :  { %127 = vst.msk [vmem:[#allocation2 + $0x100] sm:$0xff] %vm9_vm0, %v94_v0  ;;  %128 = vst.msk [vmem:[#allocation2 + $0x108] sm:$0xff] %vm9_vm0, %v95_v1  ;;  %v166_v24 = vld [vmem:[#allocation2 + $0x58] sm:$0xff]  ;;  %v195_v26 = vadd.f32 %v226_v7, %v179_v14  ;;  %v181_v27 = vmul.f32 0.5, %v165_v22  ;;  %v230_v28 = vmul.f32 0.25, %v214_v23  ;;  %v215_v29 = vld [vmem:[#allocation2 + $0x68] sm:$0xff] }
  0x17   :  { %v167_v30 = vld [vmem:[#allocation2 + $0x70] sm:$0xff]  ;;  %v216_v31 = vld [vmem:[#allocation2 + $0x80] sm:$0xff]  ;;  %v196_v33 = vadd.f32 %v227_v13, %v180_v20  ;;  %v182_v34 = vmul.f32 0.5, %v166_v24  ;;  %v231_v35 = vmul.f32 0.25, %v215_v29  ;;  %v168_v36 = vld [vmem:[#allocation2 + $0x78] sm:$0xff]  ;;  %v243_v39 = vadd.f32 %v227_v13, %v194_v25  ;;  %258 = vst.msk [vmem:[#allocation3 + $0x1] sm:$0xff] %vm9_vm0, %v242_v32 }
  0x18   :  { %v217_v37 = vld [vmem:[#allocation2 + $0x88] sm:$0xff]  ;;  %v169_v38 = vld [vmem:[#allocation2 + $0x90] sm:$0xff]  ;;  %v244_v40 = vadd.f32 %v228_v19, %v195_v26  ;;  %v197_v41 = vadd.f32 %v228_v19, %v181_v27  ;;  %v183_v42 = vmul.f32 0.5, %v167_v30  ;;  %v218_v43 = vld [vmem:[#allocation2 + $0xa0] sm:$0xff]  ;;  %v232_v47 = vmul.f32 0.25, %v216_v31 }
  0x19   :  { %v170_v44 = vld [vmem:[#allocation2 + $0x98] sm:$0xff]  ;;  %v245_v45 = vadd.f32 %v229_v21, %v196_v33  ;;  %v198_v46 = vadd.f32 %v229_v21, %v182_v34  ;;  %v184_v48 = vmul.f32 0.5, %v168_v36  ;;  %v219_v49 = vld [vmem:[#allocation2 + $0xa8] sm:$0xff]  ;;  %v171_v50 = vld [vmem:[#allocation2 + $0xb0] sm:$0xff]  ;;  %259 = vst.msk [vmem:[#allocation3 + $0x9] sm:$0xff] %vm9_vm0, %v243_v39  ;;  %v233_v53 = vmul.f32 0.25, %v217_v37 }
  0x1a   :  { %260 = vst.msk [vmem:[#allocation3 + $0x19] sm:$0xff] %vm9_vm0, %v244_v40  ;;  %v246_v51 = vadd.f32 %v230_v28, %v197_v41  ;;  %v199_v52 = vadd.f32 %v230_v28, %v183_v42  ;;  %v185_v54 = vmul.f32 0.5, %v169_v38  ;;  %v220_v55 = vld [vmem:[#allocation2 + $0xc0] sm:$0xff]  ;;  %v172_v56 = vld [vmem:[#allocation2 + $0xb8] sm:$0xff]  ;;  %v234_v59 = vmul.f32 0.25, %v218_v43  ;;  %v221_v61 = vld [vmem:[#allocation2 + $0xc8] sm:$0xff] }
  0x1b   :  { %261 = vst.msk [vmem:[#allocation3 + $0x21] sm:$0xff] %vm9_vm0, %v245_v45  ;;  %v247_v57 = vadd.f32 %v231_v35, %v198_v46  ;;  %v200_v58 = vadd.f32 %v231_v35, %v184_v48  ;;  %v186_v60 = vmul.f32 0.5, %v170_v44  ;;  %v173_v62 = vld [vmem:[#allocation2 + $0xd0] sm:$0xff]  ;;  %v235_v1 = vmul.f32 0.25, %v219_v49  ;;  %v222_v3 = vld [vmem:[#allocation2 + $0xe0] sm:$0xff]  ;;  %v174_v4 = vld [vmem:[#allocation2 + $0xd8] sm:$0xff] }
  0x1c   :  { %262 = vst.msk [vmem:[#allocation3 + $0x31] sm:$0xff] %vm9_vm0, %v246_v51  ;;  %v248_v63 = vadd.f32 %v232_v47, %v199_v52  ;;  %v201_v0 = vadd.f32 %v232_v47, %v185_v54  ;;  %v187_v2 = vmul.f32 0.5, %v171_v50  ;;  %v236_v7 = vmul.f32 0.25, %v220_v55  ;;  %v223_v9 = vld [vmem:[#allocation2 + $0xe8] sm:$0xff]  ;;  %v175_v10 = vld [vmem:[#allocation2 + $0xf0] sm:$0xff] }
  0x1d   :  { %263 = vst.msk [vmem:[#allocation3 + $0x39] sm:$0xff] %vm9_vm0, %v247_v57  ;;  %v249_v5 = vadd.f32 %v233_v53, %v200_v58  ;;  %v202_v6 = vadd.f32 %v233_v53, %v186_v60  ;;  %v188_v8 = vmul.f32 0.5, %v172_v56 }
  0x1e   :  { %6 = vsyncpa [#allocation5], 0  ;;  %264 = vst.msk [vmem:[#allocation3 + $0x49] sm:$0xff] %vm9_vm0, %v248_v63  ;;  %v250_v11 = vadd.f32 %v234_v59, %v201_v0  ;;  %v203_v12 = vadd.f32 %v234_v59, %v187_v2  ;;  %v237_v13 = vmul.f32 0.25, %v221_v61  ;;  %v189_v14 = vmul.f32 0.5, %v173_v62  ;;  %v224_v15 = vld [vmem:[#allocation2 + $0x100] sm:$0xff] }
  0x1f   :  { %v176_v16 = vld [vmem:[#allocation2 + $0xf8] sm:$0xff]  ;;  %265 = vst.msk [vmem:[#allocation3 + $0x51] sm:$0xff] %vm9_vm0, %v249_v5  ;;  %v251_v17 = vadd.f32 %v235_v1, %v202_v6  ;;  %v204_v18 = vadd.f32 %v235_v1, %v188_v8  ;;  %v238_v19 = vmul.f32 0.25, %v222_v3  ;;  %v190_v20 = vmul.f32 0.5, %v174_v4  ;;  %v225_v21 = vld [vmem:[#allocation2 + $0x108] sm:$0xff]  ;;  %s494_s0 = smov [#allocation4]  }
  0x20   :  { %266 = vst.msk [vmem:[#allocation3 + $0x61] sm:$0xff] %vm9_vm0, %v250_v11  ;;  %v252_v22 = vadd.f32 %v236_v7, %v203_v12  ;;  %v205_v23 = vadd.f32 %v236_v7, %v189_v14  ;;  %v239_v24 = vmul.f32 0.25, %v223_v9  ;;  %v191_v25 = vmul.f32 0.5, %v175_v10  ;;  %v274_v30 = vld [vmem:[#allocation3] ss:$2 sm:$0xff]  ;;  %s438_s12 = sshll.u32 %s494_s0, 4  ;;  %s439_s12 = int_to_ptr.vmem [resolvable:$true] %s438_s12 }
  0x21   :  { %267 = vst.msk [vmem:[#allocation3 + $0x69] sm:$0xff] %vm9_vm0, %v251_v17  ;;  %v253_v26 = vadd.f32 %v237_v13, %v204_v18  ;;  %v206_v27 = vadd.f32 %v237_v13, %v190_v20  ;;  %v240_v28 = vmul.f32 0.25, %v224_v15  ;;  %v192_v29 = vmul.f32 0.5, %v176_v16  ;;  %v298_v31 = vld [vmem:[#allocation3 + $0x1] ss:$2 sm:$0xff]  ;;  %s469_s13 = scalar_lea.vmem %s439_s12, 1024  ;;  %p474_p1 = scmp.lt.s32.totalorder %s439_s12, %s439_s12 }
  0x22   :  { %268 = vst.msk [vmem:[#allocation3 + $0x79] sm:$0xff] %vm9_vm0, %v252_v22  ;;  %v254_v32 = vadd.f32 %v238_v19, %v205_v23  ;;  %v207_v33 = vadd.f32 %v238_v19, %v191_v25  ;;  %v241_v34 = vmul.f32 0.25, %v225_v21  ;;  %v289_v35 = vmul.f32 0.25, %v274_v30  ;;  %v330_v36 = vld [vmem:[#allocation3 + $0x2] ss:$2 sm:$0xff]  ;;  %p470_p0 = scmp.ne.s32.totalorder %s439_s12, %s469_s13  ;;  %p475_p2 = scmp.lt.s32.totalorder %s469_s13, %s469_s13 }
  0x23   :  { %v276_v37 = vld [vmem:[#allocation3 + $0x18] ss:$2 sm:$0xff]  ;;  %269 = vst.msk [vmem:[#allocation3 + $0x81] sm:$0xff] %vm9_vm0, %v253_v26  ;;  %v255_v38 = vadd.f32 %v239_v24, %v206_v27  ;;  %v208_v39 = vadd.f32 %v239_v24, %v192_v29  ;;  %v313_v40 = vmul.f32 0.5, %v298_v31  ;;  %v300_v41 = vld [vmem:[#allocation3 + $0x19] ss:$2 sm:$0xff] }
  0x24   :  { %v332_v42 = vld [vmem:[#allocation3 + $0x1a] ss:$2 sm:$0xff]  ;;  %270 = vst.msk [vmem:[#allocation3 + $0x91] sm:$0xff] %vm9_vm0, %v254_v32  ;;  %v256_v43 = vadd.f32 %v240_v28, %v207_v33  ;;  %v290_v44 = vmul.f32 0.25, %v276_v37  ;;  %v314_v45 = vmul.f32 0.5, %v300_v41  ;;  %v345_v49 = vmul.f32 0.25, %v330_v36  ;;  %p476_p3 = por %p475_p2, %p474_p1 }
  0x25   :  { %v278_v46 = vld [vmem:[#allocation3 + $0x30] ss:$2 sm:$0xff]  ;;  %271 = vst.msk [vmem:[#allocation3 + $0x99] sm:$0xff] %vm9_vm0, %v255_v38  ;;  %v257_v47 = vadd.f32 %v241_v34, %v208_v39  ;;  %v321_v48 = vadd.f32 %v313_v40, %v289_v35  ;;  %v302_v51 = vld [vmem:[#allocation3 + $0x31] ss:$2 sm:$0xff]  ;;  %v346_v54 = vmul.f32 0.25, %v332_v42 }
  0x26   :  { %v291_v50 = vmul.f32 0.25, %v278_v46  ;;  %v334_v52 = vld [vmem:[#allocation3 + $0x32] ss:$2 sm:$0xff]  ;;  %272 = vst.msk [vmem:[#allocation3 + $0xa9] sm:$0xff] %vm9_vm0, %v256_v43  ;;  %v322_v53 = vadd.f32 %v314_v45, %v290_v44  ;;  %v315_v55 = vmul.f32 0.5, %v302_v51  ;;  %p477_p4 = pnand %p476_p3, %p470_p0 }
  0x27   :  { %v280_v56 = vld [vmem:[#allocation3 + $0x48] ss:$2 sm:$0xff]  ;;  %v304_v57 = vld [vmem:[#allocation3 + $0x49] ss:$2 sm:$0xff]  ;;  %273 = vst.msk [vmem:[#allocation3 + $0xb1] sm:$0xff] %vm9_vm0, %v257_v47  ;;  %v353_v58 = vadd.f32 %v345_v49, %v321_v48  ;;  %v347_v59 = vmul.f32 0.25, %v334_v52 }
  0x28   :  { %v292_v60 = vmul.f32 0.25, %v280_v56  ;;  %v316_v61 = vmul.f32 0.5, %v304_v57  ;;  %v354_v62 = vadd.f32 %v346_v54, %v322_v53  ;;  %v323_v63 = vadd.f32 %v315_v55, %v291_v50  ;;  %v336_v0 = vld [vmem:[#allocation3 + $0x4a] ss:$2 sm:$0xff]  ;;  %v306_v2 = vld [vmem:[#allocation3 + $0x61] ss:$2 sm:$0xff] }
  0x29   :  { %v282_v1 = vld [vmem:[#allocation3 + $0x60] ss:$2 sm:$0xff]  ;;  %v361_v3 = vadd.f32 1e-12, %v353_v58  ;;  %v317_v6 = vmul.f32 0.5, %v306_v2  ;;  %v348_v10 = vmul.f32 0.25, %v336_v0 }
  0x2a   :  { %v324_v4 = vadd.f32 %v316_v61, %v292_v60  ;;  %v293_v5 = vmul.f32 0.25, %v282_v1  ;;  %v362_v7 = vadd.f32 1e-12, %v354_v62  ;;  %v355_v8 = vadd.f32 %v347_v59, %v323_v63  ;;  %v284_v9 = vld [vmem:[#allocation3 + $0x78] ss:$2 sm:$0xff] }
  0x2b   :  { %453 = vrsqrt.f32 %v361_v3  ;;  %v338_v11 = vld [vmem:[#allocation3 + $0x62] ss:$2 sm:$0xff]  ;;  %v308_v12 = vld [vmem:[#allocation3 + $0x79] ss:$2 sm:$0xff]  ;;  %v294_v16 = vmul.f32 0.25, %v284_v9  ;;  %vm371_vm2 = vcmp.eq.f32.partialorder %v361_v3, inf }
  0x2c   :  { %455 = vrsqrt.f32 %v362_v7  ;;  %v363_v13 = vadd.f32 1e-12, %v355_v8  ;;  %v356_v14 = vadd.f32 %v348_v10, %v324_v4  ;;  %v325_v15 = vadd.f32 %v317_v6, %v293_v5  ;;  %v286_v17 = vld [vmem:[#allocation3 + $0x90] ss:$2 sm:$0xff]  ;;  %v310_v21 = vld [vmem:[#allocation3 + $0x91] ss:$2 sm:$0xff] }
  0x2d   :  { %v349_v18 = vmul.f32 0.25, %v338_v11  ;;  %v318_v19 = vmul.f32 0.5, %v308_v12  ;;  %v340_v20 = vld [vmem:[#allocation3 + $0x7a] ss:$2 sm:$0xff]  ;;  %v295_v22 = vmul.f32 0.25, %v286_v17  ;;  %v319_v26 = vmul.f32 0.5, %v310_v21 }
  0x2e   :  { %457 = vrsqrt.f32 %v363_v13  ;;  %v364_v23 = vadd.f32 1e-12, %v356_v14  ;;  %v288_v27 = vld [vmem:[#allocation3 + $0xa8] ss:$2 sm:$0xff]  ;;  %v350_v28 = vmul.f32 0.25, %v340_v20  ;;  %vm373_vm3 = vcmp.eq.f32.partialorder %v361_v3, 0.0 }
  0x2f   :  { %v357_v24 = vadd.f32 %v349_v18, %v325_v15  ;;  %v326_v25 = vadd.f32 %v318_v19, %v294_v16  ;;  %v342_v29 = vld [vmem:[#allocation3 + $0x92] ss:$2 sm:$0xff]  ;;  %v312_v30 = vld [vmem:[#allocation3 + $0xa9] ss:$2 sm:$0xff]  ;;  %v296_v31 = vmul.f32 0.25, %v288_v27  ;;  %v327_v34 = vadd.f32 %v319_v26, %v295_v22 }
  0x30   :  { %459 = vrsqrt.f32 %v364_v23  ;;  %v320_v35 = vmul.f32 0.5, %v312_v30  ;;  %v351_v36 = vmul.f32 0.25, %v342_v29  ;;  %v344_v38 = vld [vmem:[#allocation3 + $0xaa] ss:$2 sm:$0xff]  ;;  %v374_v44 = vand.u32 2147483648, %v361_v3 }
  0x31   :  { %v365_v32 = vadd.f32 1e-12, %v357_v24  ;;  %v358_v33 = vadd.f32 %v350_v28, %v326_v25  ;;  %vm378_vm4 = vcmp.eq.f32.partialorder %v362_v7, inf  ;;  %v381_v47 = vand.u32 2147483648, %v362_v7 }
  0x32   :  { %v359_v42 = vadd.f32 %v351_v36, %v327_v34  ;;  %v328_v43 = vadd.f32 %v320_v35, %v296_v31  ;;  %v352_v48 = vmul.f32 0.25, %v344_v38  ;;  %vm380_vm5 = vcmp.eq.f32.partialorder %v362_v7, 0.0 }
  0x33   :  { %461 = vrsqrt.f32 %v365_v32  ;;  %v366_v41 = vadd.f32 1e-12, %v358_v33  ;;  %vm385_vm6 = vcmp.eq.f32.partialorder %v363_v13, inf  ;;  %v388_v56 = vand.u32 2147483648, %v363_v13 }
  0x34   :  { %v367_v52 = vadd.f32 1e-12, %v359_v42  ;;  %v360_v55 = vadd.f32 %v352_v48, %v328_v43  ;;  %vm387_vm7 = vcmp.eq.f32.partialorder %v363_v13, 0.0  ;;  %vm392_vm8 = vcmp.eq.f32.partialorder %v364_v23, inf }
  0x35   :  { %v454_v37 = vpop.eup %453  ;;  %463 = vrsqrt.f32 %v366_v41  ;;  %v395_v62 = vand.u32 2147483648, %v364_v23  ;;  %vm394_vm9 = vcmp.eq.f32.partialorder %v364_v23, 0.0  ;;  %vm399_vm10 = vcmp.eq.f32.partialorder %v365_v32, inf }
  0x36   :  { %v456_v39 = vpop.eup %455  ;;  %v370_v40 = vmul.f32 %v454_v37, %v361_v3  ;;  %465 = vrsqrt.f32 %v367_v52  ;;  %v368_v59 = vadd.f32 1e-12, %v360_v55  ;;  %vm401_vm11 = vcmp.eq.f32.partialorder %v365_v32, 0.0 }
  0x37   :  { %v377_v45 = vmul.f32 %v456_v39, %v362_v7  ;;  %vm406_vm12 = vcmp.eq.f32.partialorder %v366_v41, inf  ;;  %v409_v8 = vand.u32 2147483648, %v366_v41  ;;  %vm408_vm13 = vcmp.eq.f32.partialorder %v366_v41, 0.0 }
  0x38   :  { %v372_v46 = vsel %vm371_vm2, %v361_v3, %v370_v40  ;;  %v458_v49 = vpop.eup %457  ;;  %467 = vrsqrt.f32 %v368_v59  ;;  %v402_v3 = vand.u32 2147483648, %v365_v32  ;;  %vm413_vm14 = vcmp.eq.f32.partialorder %v367_v52, inf }
  0x39   :  { %v375_v50 = vsel %vm373_vm3, %v374_v44, %v372_v46  ;;  %v379_v51 = vsel %vm378_vm4, %v362_v7, %v377_v45  ;;  %v384_v54 = vmul.f32 %v458_v49, %v363_v13  ;;  %vm415_vm15 = vcmp.eq.f32.partialorder %v367_v52, 0.0 }
  0x3a   :  { %425 = vst.msk [vmem:[#allocation4] sm:$0xff] %vm9_vm0, %v375_v50  ;;  %v382_v53 = vsel %vm380_vm5, %v381_v47, %v379_v51  ;;  %v460_v57 = vpop.eup %459  ;;  %vm420_vm1 = vcmp.eq.f32.partialorder %v368_v59, inf  ;;  %v423_v18 = vand.u32 2147483648, %v368_v59  ;;  %vm422_vm2 = vcmp.eq.f32.partialorder %v368_v59, 0.0 }
  0x3b   :  { %426 = vst.msk [vmem:[#allocation4 + $0x8] sm:$0xff] %vm9_vm0, %v382_v53  ;;  %v386_v58 = vsel %vm385_vm6, %v363_v13, %v384_v54  ;;  %v391_v61 = vmul.f32 %v460_v57, %v364_v23  ;;  %v416_v13 = vand.u32 2147483648, %v367_v52 }
  0x3c   :  { %v389_v60 = vsel %vm387_vm7, %v388_v56, %v386_v58 }
  0x3d   :  { %427 = vst.msk [vmem:[#allocation4 + $0x10] sm:$0xff] %vm9_vm0, %v389_v60  ;;  %v462_v63 = vpop.eup %461  ;;  %v393_v0 = vsel %vm392_vm8, %v364_v23, %v391_v61 }
  0x3e   :  { %v396_v1 = vsel %vm394_vm9, %v395_v62, %v393_v0  ;;  %v398_v2 = vmul.f32 %v462_v63, %v365_v32 }
  0x3f   :  { %428 = vst.msk [vmem:[#allocation4 + $0x18] sm:$0xff] %vm9_vm0, %v396_v1  ;;  %v464_v4 = vpop.eup %463 }
  0x40   :  { %v400_v5 = vsel %vm399_vm10, %v365_v32, %v398_v2  ;;  %v405_v7 = vmul.f32 %v464_v4, %v366_v41  ;;  %v466_v9 = vpop.eup %465 }
  0x41   :  { %v403_v6 = vsel %vm401_vm11, %v402_v3, %v400_v5  ;;  %v412_v12 = vmul.f32 %v466_v9, %v367_v52 }
  0x42   :  { %429 = vst.msk [vmem:[#allocation4 + $0x20] sm:$0xff] %vm9_vm0, %v403_v6  ;;  %v407_v10 = vsel %vm406_vm12, %v366_v41, %v405_v7  ;;  %v468_v14 = vpop.eup %467 }
  0x43   :  { %v410_v11 = vsel %vm408_vm13, %v409_v8, %v407_v10  ;;  %v414_v15 = vsel %vm413_vm14, %v367_v52, %v412_v12  ;;  %v419_v17 = vmul.f32 %v468_v14, %v368_v59 }
  0x44   :  { %430 = vst.msk [vmem:[#allocation4 + $0x28] sm:$0xff] %vm9_vm0, %v410_v11  ;;  %v417_v16 = vsel %vm415_vm15, %v416_v13, %v414_v15 }
  0x45   :  { %431 = vst.msk [vmem:[#allocation4 + $0x30] sm:$0xff] %vm9_vm0, %v417_v16  ;;  %v421_v19 = vsel %vm420_vm1, %v368_v59, %v419_v17 }
  0x46   :  { %v424_v20 = vsel %vm422_vm2, %v423_v18, %v421_v19 }
  0x47   :  { %432 = vst.msk [vmem:[#allocation4 + $0x38] sm:$0xff] %vm9_vm0, %v424_v20 }
  0x48   :  { %480 = shalt.err (!%p477_p4)
}
  0x49   :  { %s481_s16 = scalar_lea.hbm %s682_s1, 1024 }
  0x4a   :  { %p482_p5 = scmp.ne.s32.totalorder %s682_s1, %s481_s16  ;;  %p485_p6 = scmp.lt.u32.totalorder %s481_s16, %s682_s1 }
  0x4c   :  { %p487_p7 = pnand %p485_p6, %p482_p5 }
  0x4e   :  { %490 = shalt.err (!%p487_p7)
}
  0x4f   :  { %s495_s21 = smov 128   ;;  %s496_s22 = smov 8  }
  0x50   :  { %444 = dma.vmem_to_hbm [thread:$0]  %s439_s12, 1024, %s682_s1, [#allocation5], %s495_s21, %s495_s21, %s496_s22  }
  0x51   :  { %491 = dma.done.wait [#allocation5], 1024  }
  0x52   :  { %492 = vsyncadd [#allocation5], 4294966272 }
  0x53   :  { %448 = vsyncpa [#allocation5], 1 }

</bundles_post_ra>
